<compile_context>
chip_gen: v7x
topology: tpu7x:2x2x1
jax: 0.10.0
libtpu: 0.0.40
codegen_flags: <defaults>
</compile_context>

<pallas_src>
import math

import jax
import jax.numpy as jnp
import numpy as np
from jax.experimental import pallas as pl
from jax.experimental.pallas import tpu as pltpu

WIN = 11
SIGMA = 1.5
K1, K2 = 0.01, 0.03


def _gaussian_window(win=WIN, sigma=SIGMA):
    center = (win - 1) / 2.0
    g = np.array(
        [math.exp(-((i - center) ** 2) / (2.0 * sigma * sigma)) for i in range(win)],
        dtype=np.float64,
    )
    return (g / g.sum()).astype(np.float32)


_GW = _gaussian_window()  # deterministic 11-tap normalized window


def _band_matrices(H, W):
    """Banded matrices implementing the separable 'valid' Gaussian filter.

    horizontal:  (H, W)  @ Gh(W, Wo)  -> (H, Wo)
    vertical:    Gv(Ho,H) @ (H, Wo)   -> (Ho, Wo)
    """
    Ho, Wo = H - WIN + 1, W - WIN + 1
    gh = np.zeros((W, Wo), np.float32)
    for j in range(Wo):
        gh[j:j + WIN, j] = _GW
    gv = np.zeros((Ho, H), np.float32)
    for o in range(Ho):
        gv[o, o:o + WIN] = _GW
    return gh, gv


def _make_ssim_kernel(H, W, data_range):
    Ho, Wo = H - WIN + 1, W - WIN + 1
    C1 = np.float32((K1 * data_range) ** 2)
    C2 = np.float32((K2 * data_range) ** 2)
    HIGHEST = jax.lax.Precision.HIGHEST

    def kernel(x_ref, y_ref, gh_ref, gv_ref, out_ref):
        # One (H, W) image pair per grid step (B, C dims squeezed by BlockSpec).
        x = x_ref[...].astype(jnp.float32)
        y = y_ref[...].astype(jnp.float32)
        gh = gh_ref[...]
        gv = gv_ref[...]

        # Stack the five quantities that need Gaussian filtering along the
        # sublane axis and run ONE horizontal-filter matmul on the MXU.
        stacked = jnp.concatenate([x, y, x * x, y * y, x * y], axis=0)  # (5H, W)
        hfilt = jnp.dot(stacked, gh,
                        preferred_element_type=jnp.float32,
                        precision=HIGHEST)                              # (5H, Wo)

        # Vertical filter pass (contraction over H) per stacked component.
        def vfilt(i):
            return jnp.dot(gv, hfilt[i * H:(i + 1) * H, :],
                           preferred_element_type=jnp.float32,
                           precision=HIGHEST)                           # (Ho, Wo)

        mu1, mu2, e_xx, e_yy, e_xy = (vfilt(i) for i in range(5))

        mu1_sq = mu1 * mu1
        mu2_sq = mu2 * mu2
        mu1_mu2 = mu1 * mu2

        # Fused single-division SSIM map:
        #   ((2*mu1mu2 + C1) * (2*sigma12 + C2)) /
        #   ((mu1^2 + mu2^2 + C1) * (sigma1^2 + sigma2^2 + C2))
        num = (2.0 * mu1_mu2 + C1) * (2.0 * (e_xy - mu1_mu2) + C2)
        den = (mu1_sq + mu2_sq + C1) * ((e_xx - mu1_sq) + (e_yy - mu2_sq) + C2)
        ssim_map = num / den

        # Per-tile partial sum; the mean (divide by B*C*Ho*Wo) happens outside.
        out_ref[...] = jnp.sum(ssim_map, keepdims=True)

    return kernel


def ssim_metric(y_pred, y_true, max_val=1.0):
    """Pallas equivalent of SSIMMetric.forward(y_pred, y_true)."""
    assert y_pred.shape == y_true.shape
    B, C, H, W = y_pred.shape
    assert H >= WIN and W >= WIN, "spatial dims must be >= 11 for valid filtering"
    Ho, Wo = H - WIN + 1, W - WIN + 1

    gh_np, gv_np = _band_matrices(H, W)
    kernel = _make_ssim_kernel(H, W, float(max_val))

    # Rough per-tile VMEM budget (f32): double-buffered inputs + stacked /
    # filtered intermediates + banded filter matrices.  Clamp to [32, 64] MiB so
    # it stays legal on v7x (64 MiB physical VMEM) and is a no-op for tiny tiles.
    tile_bytes = 4 * (2 * 2 * H * W        # x, y (double-buffered)
                      + 5 * H * W          # stacked
                      + 5 * H * Wo         # horizontal pass
                      + 12 * Ho * Wo       # filtered + elementwise temps
                      + W * Wo + Ho * H)   # Gh, Gv
    vmem_limit = int(min(max(2 * tile_bytes, 32 * 1024 * 1024), 64 * 1024 * 1024))

    partial_sums = pl.pallas_call(
        kernel,
        out_shape=jax.ShapeDtypeStruct((B, C, 1, 1), jnp.float32),
        grid_spec=pltpu.PrefetchScalarGridSpec(
            num_scalar_prefetch=0,
            grid=(B, C),
            in_specs=[
                pl.BlockSpec((None, None, H, W), lambda b, c: (b, c, 0, 0)),
                pl.BlockSpec((None, None, H, W), lambda b, c: (b, c, 0, 0)),
                pl.BlockSpec((W, Wo), lambda b, c: (0, 0)),   # Gh (grid-invariant)
                pl.BlockSpec((Ho, H), lambda b, c: (0, 0)),   # Gv (grid-invariant)
            ],
            out_specs=pl.BlockSpec((None, None, 1, 1), lambda b, c: (b, c, 0, 0)),
        ),
        compiler_params=pltpu.CompilerParams(
            dimension_semantics=("parallel", "parallel"),
            vmem_limit_bytes=vmem_limit,
        ),
    )(y_true, y_pred, jnp.asarray(gh_np), jnp.asarray(gv_np))
    # note: forward calls ssim(y_true, y_pred, ...)

    total = jnp.sum(partial_sums, dtype=jnp.float32)
    return total / np.float32(B * C * Ho * Wo)


def _ssim_reference(y_pred, y_true, max_val=1.0):
    """Pure-JAX reference of the same SSIM definition (for correctness check)."""
    x = y_true.astype(jnp.float32)
    y = y_pred.astype(jnp.float32)
    w = jnp.asarray(_GW, jnp.float32)
    B, C, H, W = x.shape
    Ho, Wo = H - WIN + 1, W - WIN + 1
    C1 = (K1 * max_val) ** 2
    C2 = (K2 * max_val) ** 2

    def gfilt(img):
        acc_w = jnp.zeros((B, C, H, Wo), jnp.float32)
        for k in range(WIN):
            acc_w = acc_w + w[k] * img[:, :, :, k:k + Wo]
        acc_h = jnp.zeros((B, C, Ho, Wo), jnp.float32)
        for k in range(WIN):
            acc_h = acc_h + w[k] * acc_w[:, :, k:k + Ho, :]
        return acc_h

    mu1, mu2 = gfilt(x), gfilt(y)
    s1 = gfilt(x * x) - mu1 * mu1
    s2 = gfilt(y * y) - mu2 * mu2
    s12 = gfilt(x * y) - mu1 * mu2
    cs = (2 * s12 + C2) / (s1 + s2 + C2)
    ssim_map = ((2 * mu1 * mu2 + C1) / (mu1 * mu1 + mu2 * mu2 + C1)) * cs
    return jnp.mean(ssim_map)


if __name__ == "__main__":
    key = jax.random.PRNGKey(0)
    k1, k2 = jax.random.split(key)
    # Small NCHW image pairs in [0, 1], consistent with the module.
    y_pred = jax.random.uniform(k1, (2, 4, 16, 16), dtype=jnp.float32)
    y_true = jax.random.uniform(k2, (2, 4, 16, 16), dtype=jnp.float32)

    out = ssim_metric(y_pred, y_true, max_val=1.0)
    out = jax.block_until_ready(out)

    ref = jax.block_until_ready(_ssim_reference(y_pred, y_true, max_val=1.0))
    assert np.allclose(np.asarray(out), np.asarray(ref), rtol=1e-4, atol=1e-5), (out, ref)

    print("KERNEL_OK")
</pallas_src>

<mosaic_0001>
module attributes {stable_mosaic.version = 11 : i64} {
  func.func @kernel(%arg0: i32, %arg1: i32, %arg2: memref<1x1x16x16xf32, #tpu.memory_space<vmem>>, %arg3: memref<1x1x16x16xf32, #tpu.memory_space<vmem>>, %arg4: memref<16x6xf32, #tpu.memory_space<vmem>>, %arg5: memref<6x16xf32, #tpu.memory_space<vmem>>, %arg6: memref<1x1x1x1xf32, #tpu.memory_space<vmem>>) attributes {dimension_semantics = [#tpu.dimension_semantics<parallel>, #tpu.dimension_semantics<parallel>], iteration_bounds = array<i64: 2, 4>, scalar_prefetch = 0 : i64, scratch_operands = 0 : i64, tpu.core_type = #tpu.core_type<tc>, window_params = [{transform_indices = @transform_0, window_bounds = array<i64: 1, 1, 16, 16>}, {transform_indices = @transform_1, window_bounds = array<i64: 1, 1, 16, 16>}, {pipeline_mode = #tpu.pipeline_mode<synchronous>, transform_indices = @transform_2, window_bounds = array<i64: 16, 6>}, {pipeline_mode = #tpu.pipeline_mode<synchronous>, transform_indices = @transform_3, window_bounds = array<i64: 6, 16>}, {transform_indices = @transform_4, window_bounds = array<i64: 1, 1, 1, 1>}]} {
    %c0 = arith.constant 0 : index
    %c0_0 = arith.constant 0 : index
    %c0_1 = arith.constant 0 : index
    %c0_2 = arith.constant 0 : index
    %0 = vector.load %arg2[%c0, %c0_0, %c0_1, %c0_2] : memref<1x1x16x16xf32, #tpu.memory_space<vmem>>, vector<1x1x16x16xf32>
    %1 = vector.shape_cast %0 : vector<1x1x16x16xf32> to vector<16x16xf32>
    %c0_3 = arith.constant 0 : index
    %c0_4 = arith.constant 0 : index
    %c0_5 = arith.constant 0 : index
    %c0_6 = arith.constant 0 : index
    %2 = vector.load %arg3[%c0_3, %c0_4, %c0_5, %c0_6] : memref<1x1x16x16xf32, #tpu.memory_space<vmem>>, vector<1x1x16x16xf32>
    %3 = vector.shape_cast %2 : vector<1x1x16x16xf32> to vector<16x16xf32>
    %c0_7 = arith.constant 0 : index
    %c0_8 = arith.constant 0 : index
    %4 = vector.load %arg4[%c0_7, %c0_8] : memref<16x6xf32, #tpu.memory_space<vmem>>, vector<16x6xf32>
    %c0_9 = arith.constant 0 : index
    %c0_10 = arith.constant 0 : index
    %5 = vector.load %arg5[%c0_9, %c0_10] : memref<6x16xf32, #tpu.memory_space<vmem>>, vector<6x16xf32>
    %6 = arith.mulf %1, %1 : vector<16x16xf32>
    %7 = arith.mulf %3, %3 : vector<16x16xf32>
    %8 = arith.mulf %1, %3 : vector<16x16xf32>
    %9 = tpu.concatenate %1, %3, %6, %7, %8 in 0 : vector<16x16xf32>, vector<16x16xf32>, vector<16x16xf32>, vector<16x16xf32>, vector<16x16xf32> -> vector<80x16xf32>
    %cst = arith.constant dense<0.000000e+00> : vector<80x6xf32>
    %10 = tpu.matmul %9, %4, %cst {dimension_numbers = #tpu.dot_dimension_numbers<[1], [0], [0], [1], [0, 0, 1, 1], [], []>, precision = #tpu.contract_precision<fp32>} : vector<80x16xf32>, vector<16x6xf32>, vector<80x6xf32> -> vector<80x6xf32>
    %11 = vector.extract_strided_slice %10 {offsets = [0, 0], sizes = [16, 6], strides = [1, 1]} : vector<80x6xf32> to vector<16x6xf32>
    %cst_11 = arith.constant dense<0.000000e+00> : vector<6x6xf32>
    %12 = tpu.matmul %5, %11, %cst_11 {dimension_numbers = #tpu.dot_dimension_numbers<[1], [0], [0], [1], [0, 0, 1, 1], [], []>, precision = #tpu.contract_precision<fp32>} : vector<6x16xf32>, vector<16x6xf32>, vector<6x6xf32> -> vector<6x6xf32>
    %13 = vector.extract_strided_slice %10 {offsets = [16, 0], sizes = [16, 6], strides = [1, 1]} : vector<80x6xf32> to vector<16x6xf32>
    %cst_12 = arith.constant dense<0.000000e+00> : vector<6x6xf32>
    %14 = tpu.matmul %5, %13, %cst_12 {dimension_numbers = #tpu.dot_dimension_numbers<[1], [0], [0], [1], [0, 0, 1, 1], [], []>, precision = #tpu.contract_precision<fp32>} : vector<6x16xf32>, vector<16x6xf32>, vector<6x6xf32> -> vector<6x6xf32>
    %15 = vector.extract_strided_slice %10 {offsets = [32, 0], sizes = [16, 6], strides = [1, 1]} : vector<80x6xf32> to vector<16x6xf32>
    %cst_13 = arith.constant dense<0.000000e+00> : vector<6x6xf32>
    %16 = tpu.matmul %5, %15, %cst_13 {dimension_numbers = #tpu.dot_dimension_numbers<[1], [0], [0], [1], [0, 0, 1, 1], [], []>, precision = #tpu.contract_precision<fp32>} : vector<6x16xf32>, vector<16x6xf32>, vector<6x6xf32> -> vector<6x6xf32>
    %17 = vector.extract_strided_slice %10 {offsets = [48, 0], sizes = [16, 6], strides = [1, 1]} : vector<80x6xf32> to vector<16x6xf32>
    %cst_14 = arith.constant dense<0.000000e+00> : vector<6x6xf32>
    %18 = tpu.matmul %5, %17, %cst_14 {dimension_numbers = #tpu.dot_dimension_numbers<[1], [0], [0], [1], [0, 0, 1, 1], [], []>, precision = #tpu.contract_precision<fp32>} : vector<6x16xf32>, vector<16x6xf32>, vector<6x6xf32> -> vector<6x6xf32>
    %19 = vector.extract_strided_slice %10 {offsets = [64, 0], sizes = [16, 6], strides = [1, 1]} : vector<80x6xf32> to vector<16x6xf32>
    %cst_15 = arith.constant dense<0.000000e+00> : vector<6x6xf32>
    %20 = tpu.matmul %5, %19, %cst_15 {dimension_numbers = #tpu.dot_dimension_numbers<[1], [0], [0], [1], [0, 0, 1, 1], [], []>, precision = #tpu.contract_precision<fp32>} : vector<6x16xf32>, vector<16x6xf32>, vector<6x6xf32> -> vector<6x6xf32>
    %21 = arith.mulf %12, %12 : vector<6x6xf32>
    %22 = arith.mulf %14, %14 : vector<6x6xf32>
    %23 = arith.mulf %12, %14 : vector<6x6xf32>
    %cst_16 = arith.constant 2.000000e+00 : f32
    %24 = vector.broadcast %cst_16 : f32 to vector<6x6xf32>
    %25 = arith.mulf %24, %23 : vector<6x6xf32>
    %cst_17 = arith.constant 9.99999974E-5 : f32
    %26 = vector.broadcast %cst_17 : f32 to vector<6x6xf32>
    %27 = arith.addf %25, %26 : vector<6x6xf32>
    %28 = arith.subf %20, %23 : vector<6x6xf32>
    %cst_18 = arith.constant 2.000000e+00 : f32
    %29 = vector.broadcast %cst_18 : f32 to vector<6x6xf32>
    %30 = arith.mulf %29, %28 : vector<6x6xf32>
    %cst_19 = arith.constant 8.99999984E-4 : f32
    %31 = vector.broadcast %cst_19 : f32 to vector<6x6xf32>
    %32 = arith.addf %30, %31 : vector<6x6xf32>
    %33 = arith.mulf %27, %32 : vector<6x6xf32>
    %34 = arith.addf %21, %22 : vector<6x6xf32>
    %cst_20 = arith.constant 9.99999974E-5 : f32
    %35 = vector.broadcast %cst_20 : f32 to vector<6x6xf32>
    %36 = arith.addf %34, %35 : vector<6x6xf32>
    %37 = arith.subf %16, %21 : vector<6x6xf32>
    %38 = arith.subf %18, %22 : vector<6x6xf32>
    %39 = arith.addf %37, %38 : vector<6x6xf32>
    %cst_21 = arith.constant 8.99999984E-4 : f32
    %40 = vector.broadcast %cst_21 : f32 to vector<6x6xf32>
    %41 = arith.addf %39, %40 : vector<6x6xf32>
    %42 = arith.mulf %36, %41 : vector<6x6xf32>
    %43 = arith.divf %33, %42 : vector<6x6xf32>
    %44 = vector.shape_cast %43 : vector<6x6xf32> to vector<1x6x6xf32>
    %cst_22 = arith.constant dense<0.000000e+00> : vector<1xf32>
    %45 = vector.multi_reduction <add>, %44, %cst_22 [1, 2] : vector<1x6x6xf32> to vector<1xf32>
    %46 = vector.shape_cast %45 : vector<1xf32> to vector<1x1x1xf32>
    %47 = vector.extract %46[0, 0, 0] : f32 from vector<1x1x1xf32>
    %48 = vector.broadcast %47 : f32 to vector<1x1xf32>
    %c0_23 = arith.constant 0 : index
    %c0_24 = arith.constant 0 : index
    %c0_25 = arith.constant 0 : index
    %c0_26 = arith.constant 0 : index
    %49 = vector.load %arg6[%c0_23, %c0_24, %c0_25, %c0_26] : memref<1x1x1x1xf32, #tpu.memory_space<vmem>>, vector<1x1x1x1xf32>
    %50 = vector.shape_cast %49 : vector<1x1x1x1xf32> to vector<1x1xf32>
    %51 = vector.shape_cast %48 : vector<1x1xf32> to vector<1x1x1x1xf32>
    tpu.vector_store %arg6[%c0_23, %c0_24, %c0_25, %c0_26], %51 {strides = array<i32>} : memref<1x1x1x1xf32, #tpu.memory_space<vmem>>, vector<1x1x1x1xf32>,
    return
  }
  func.func @transform_0(%arg0: i32, %arg1: i32) -> (i32, i32, i32, i32) {
    %c0_i32 = arith.constant 0 : i32
    %c0_i32_0 = arith.constant 0 : i32
    %c0_i32_1 = arith.constant 0 : i32
    return %arg0, %arg1, %c0_i32, %c0_i32_0 : i32, i32, i32, i32
  }
  func.func @transform_1(%arg0: i32, %arg1: i32) -> (i32, i32, i32, i32) {
    %c0_i32 = arith.constant 0 : i32
    %c0_i32_0 = arith.constant 0 : i32
    %c0_i32_1 = arith.constant 0 : i32
    return %arg0, %arg1, %c0_i32, %c0_i32_0 : i32, i32, i32, i32
  }
  func.func @transform_2(%arg0: i32, %arg1: i32) -> (i32, i32) {
    %c0_i32 = arith.constant 0 : i32
    %c0_i32_0 = arith.constant 0 : i32
    %c0_i32_1 = arith.constant 0 : i32
    return %c0_i32, %c0_i32_0 : i32, i32
  }
  func.func @transform_3(%arg0: i32, %arg1: i32) -> (i32, i32) {
    %c0_i32 = arith.constant 0 : i32
    %c0_i32_0 = arith.constant 0 : i32
    %c0_i32_1 = arith.constant 0 : i32
    return %c0_i32, %c0_i32_0 : i32, i32
  }
  func.func @transform_4(%arg0: i32, %arg1: i32) -> (i32, i32, i32, i32) {
    %c0_i32 = arith.constant 0 : i32
    %c0_i32_0 = arith.constant 0 : i32
    %c0_i32_1 = arith.constant 0 : i32
    return %arg0, %arg1, %c0_i32, %c0_i32_0 : i32, i32, i32, i32
  }
}

</mosaic_0001>

<bundles_post_ra>
// kernel: tpu_custom_call.1
= control target key start
LH: loop header
LB: loop body
LE: loop exit
PB: predicated region body
PF: predicated region fallthrough
CT: control target
= control target key end

     0   :  { %s5202_s0 = inlined_call_operand.hbm [shape: f32[2,4,16,16], index: 0, kind: input, shape index: {}]   ;;  %s5203_s1 = inlined_call_operand.hbm [shape: f32[2,4,16,16], index: 1, kind: input, shape index: {}]   ;;  %s5204_s2 = inlined_call_operand.vmem [shape: f32[16,6], index: 2, kind: input, shape index: {}]   ;;  %s5205_s3 = inlined_call_operand.vmem [shape: f32[6,16], index: 3, kind: input, shape index: {}]   ;;  %s5206_s4 = inlined_call_operand.vmem [shape: f32[2,4,1,1], index: 4, kind: output, shape index: {}]  }
   0x1   :  { %5208 = sst [smem:[#allocation8_spill]] %s5202_s0 }
   0x2   :  { %9 = vsyncpa [#allocation3], 0 }
   0x3   :  { %11 = vsyncpa [#allocation3 + $0x1], 0 }
   0x4   :  { %12 = vsyncpa [#allocation5], 0 }
   0x5   :  { %14 = vsyncpa [#allocation5 + $0x1], 0  ;;  %s4586_s15 = smov 0   ;;  %s4588_s16 = smov 0  }
   0x6   :  { %s4590_s17 = smov 0   ;;  %s4592_s18 = smov 0  }
   0x7   :  { %s4594_s19 = smov 0   ;;  %s4596_s20 = smov 0  }
   0x8   :  { %s4598_s21 = smov 0   ;;  %s4600_s22 = smov 0  }
   0x9 LB: > { %s3619_s23 = sadd.s32 4294967295, %s4552_s22   ;;  %s29_s24 = sadd.s32 1, %s4544_s20  ;;  %s4552_s22 = sphi %s4600_s22, %s20_s22   ;;  %s4548_s21 = sphi %s4598_s21, %s5222_s21   ;;  %s4544_s20 = sphi %s4596_s20, %s5221_s20   ;;  %s4540_s19 = sphi %s4594_s19, %s5220_s19   ;;  %s4536_s18 = sphi %s4592_s18, %s5219_s18   ;;  %s4532_s17 = sphi %s4590_s17, %s5218_s17   ;;  %s4528_s16 = sphi %s4588_s16, %s5217_s16   ;;  %s4524_s15 = sphi %s4586_s15, %s5216_s15  }
   0xa   : > { %p30_p0 = scmp.ge.s32.totalorder %s29_s24, 4  ;;  %s32_s25 = sadd.s32 1, %s4548_s21 }
   0xb   : > { %s41_s26 = sadd.s32 1, %s4532_s17  ;;  %p48_p1 = scmp.ne.s32.totalorder %s4532_s17, %s4528_s16 }
   0xc   : > { %s5224_s24 = smov (%p30_p0, %s29_s24), 0  ;;  %s5226_s25 = smov (!%p30_p0, %s32_s25), %s4548_s21 }
   0xd   : > { %s37_s27 = ssub.s32 %s4544_s20, %s5224_s24  ;;  %p49_p2 = scmp.eq.s32.totalorder %s4552_s22, 0 }
   0xe   : > { %p34_p3 = scmp.ge.s32.totalorder %s5226_s25, 2  ;;  %p54_p4 = scmp.ne.s32.totalorder %s4528_s16, %s4524_s15 }
   0xf   : > { %p4637_p5 = por %p49_p2, %p48_p1  ;;  %p55_p6 = scmp.eq.s32.totalorder %s3619_s23, 0 }
  0x10   : > { %s5228_s25 = smov (%p34_p3, %s5226_s25), 0  ;;  %p4350_p8 = scmp.lt.s32.totalorder %s4552_s22, 8 }
  0x11   : > { %p4643_p7 = por %p55_p6, %p54_p4  ;;  %s36_s30 = ssub.s32 %s4548_s21, %s5228_s25 }
  0x12   : > { %s38_s5 = sor.u32 %s37_s27, %s36_s30  ;;  %s4651_s6 = sand.u32 1, %s4532_s17  }
  0x13   : > { %s5210_s29 = scalar_select %p4643_p7, 1, 0 }
  0x14   : > { %p39_p9 = scmp.eq.s32.totalorder %s38_s5, 0  ;;  %s3623_s7 = sshll.u32 %s4651_s6, 4 }
  0x15   : > { %s3624_s8 = sshll.u32 %s4544_s20, 1  ;;  %s3625_s10 = sshll.u32 %s4548_s21, 3 }
  0x16   : > { %s4656_s9 = scalar_select %p39_p9, %s4532_s17, %s41_s26  }
  0x17   : > { %s4659_s11 = sadd.s32 %s3625_s10, %s3624_s8  ;;  %s186_s12 = scalar_lea.vmem [#allocation2], %s3623_s7 }
  0x18   : > { %s195_s13 = sshll.u32 %s186_s12, 4  ;;  %s3626_s14 = sshll.u32 %s4659_s11, 7  ;;  %s4664_s13 = int_to_ptr.vmem [resolvable:$true] %s195_s13 }
  0x19   : > { %s5211_s0 = sld [smem:[#allocation8_spill]]  ;;  %p4677_p10 = pnand %p4350_p8, %p4637_p5 }
  0x1a   : > { %s183_s30 = scalar_lea.sflag [#allocation3], %s4651_s6 }
  0x1b   : > { %p4424_p13 = pneg %p4677_p10 }
  0x1f   : > { %s4671_s27 = scalar_lea.hbm %s5211_s0, %s3626_s14  ;;  %s4427_s10 = scalar_lea.hbm %s5211_s0, 2048 }
  0x20   : > { %s4422_s5 = scalar_lea.hbm %s4671_s27, 256  ;;  %p4428_p2 = scmp.lt.u32.totalorder %s4671_s27, %s5211_s0 }
  0x21   : > { %p4423_p12 = scmp.ne.s32.totalorder %s4671_s27, %s4422_s5  ;;  %p4429_p3 = scmp.lt.u32.totalorder %s4427_s10, %s4422_s5 }
  0x22   : > { %p4431_p5 = scmp.lt.u32.totalorder %s4422_s5, %s4671_s27 }
  0x23   : > { %p4425_p0 = pnand %p4424_p13, %p4423_p12  ;;  %p4430_p4 = por %p4429_p3, %p4428_p2 }
  0x25   : > { %p4426_p1 = pneg %p4425_p0  ;;  %p4432_p6 = por %p4431_p5, %p4430_p4 }
  0x27   : > { %p4433_p8 = pnand %p4432_p6, %p4426_p1 }
  0x29   : > { %4436 = shalt.err (!%p4433_p8)
}
  0x2a   : > { %s4437_s23 = scalar_lea.vmem %s4664_s13, 256  ;;  %s4554_s28 = smov [#allocation2]  }
  0x2b   : > { %p4438_p9 = scmp.ne.s32.totalorder %s4664_s13, %s4437_s23  ;;  %s4442_s8 = sshll.u32 %s4554_s28, 4  ;;  %s4443_s8 = int_to_ptr.vmem [resolvable:$false] %s4442_s8 }
  0x2c   : > { %s4444_s12 = scalar_lea.vmem %s4443_s8, 512  ;;  %p4445_p11 = scmp.lt.s32.totalorder %s4664_s13, %s4443_s8 }
  0x2d   : > { %p4440_p12 = pnand %p4438_p9, %p4424_p13  ;;  %p4446_p2 = scmp.lt.s32.totalorder %s4444_s12, %s4437_s23 }
  0x2f   : > { %p4441_p0 = pneg %p4440_p12  ;;  %p4447_p3 = por %p4446_p2, %p4445_p11 }
  0x31   : > { %p4448_p4 = pnand %p4447_p3, %p4441_p0 }
  0x33   : > { %4451 = shalt.err (!%p4448_p4)
}
  0x34   : > { %s4555_s5 = smov 128   ;;  %s4556_s10 = smov 8  }
  0x35   : > { %4346 = dma.hbm_to_vmem [thread:$0]  (!%p4677_p10), %s4671_s27, 256, %s4664_s13, %s183_s30, %s4555_s5, %s4555_s5, %s4556_s10  }
  0x36   : > { %p226_p11 = scmp.lt.s32.totalorder %s4552_s22, 9  ;;  %s4719_s28 = scalar_lea.hbm %s5203_s1, %s3626_s14 }
  0x37   : > { %p5213_p1 = scmp.ge.s32.totalorder %s4552_s22, 1  ;;  %s209_s12 = scalar_lea.vmem [#allocation4], %s3623_s7 }
  0x38   : > { %s218_s0 = sshll.u32 %s209_s12, 4  ;;  %s206_s11 = scalar_lea.sflag [#allocation5], %s4651_s6  ;;  %s4729_s0 = int_to_ptr.vmem [resolvable:$true] %s218_s0 }
  0x39   : > { %p4723_p5 = pnand %p5213_p1, %p226_p11  ;;  %s4452_s13 = scalar_lea.hbm %s4719_s28, 256 }
  0x3a   : > { %p4453_p6 = scmp.ne.s32.totalorder %s4719_s28, %s4452_s13  ;;  %s4457_s30 = scalar_lea.hbm %s5203_s1, 2048 }
  0x3b   : > { %p4458_p12 = scmp.lt.u32.totalorder %s4719_s28, %s5203_s1  ;;  %p4459_p0 = scmp.lt.u32.totalorder %s4457_s30, %s4452_s13 }
  0x3c   : > { %p4455_p8 = pnand %p4453_p6, %p4424_p13  ;;  %p4461_p3 = scmp.lt.u32.totalorder %s4452_s13, %s4719_s28 }
  0x3d   : > { %p4460_p2 = por %p4459_p0, %p4458_p12 }
  0x3e   : > { %p4456_p9 = pneg %p4455_p8 }
  0x3f   : > { %p4462_p4 = por %p4461_p3, %p4460_p2 }
  0x41   : > { %p4463_p11 = pnand %p4462_p4, %p4456_p9 }
  0x43   : > { %4466 = shalt.err (!%p4463_p11)
}
  0x44   : > { %s4467_s7 = scalar_lea.vmem %s4729_s0, 256  ;;  %s4557_s12 = smov [#allocation4]  }
  0x45   : > { %p4468_p1 = scmp.ne.s32.totalorder %s4729_s0, %s4467_s7  ;;  %s4472_s14 = sshll.u32 %s4557_s12, 4  ;;  %s4473_s14 = int_to_ptr.vmem [resolvable:$false] %s4472_s14 }
  0x46   : > { %s4474_s27 = scalar_lea.vmem %s4473_s14, 512  ;;  %p4475_p7 = scmp.lt.s32.totalorder %s4729_s0, %s4473_s14 }
  0x47   : > { %p4470_p6 = pnand %p4468_p1, %p4424_p13  ;;  %p4476_p12 = scmp.lt.s32.totalorder %s4474_s27, %s4467_s7 }
  0x49   : > { %p4471_p8 = pneg %p4470_p6  ;;  %p4477_p0 = por %p4476_p12, %p4475_p7 }
  0x4b   : > { %p4478_p2 = pnand %p4477_p0, %p4471_p8 }
  0x4d   : > { %4481 = shalt.err (!%p4478_p2)
}
  0x4e   : > { %4349 = dma.hbm_to_vmem [thread:$0]  (!%p4677_p10), %s4719_s28, 256, %s4729_s0, %s206_s11, %s4555_s5, %s4555_s5, %s4556_s10  }
  0x4f   : > { %230 = sbr.rel (%p4723_p5) target bundleno = 1069 (0x42d), region = 36  ;;  %s232_s13 = sand.u32 (!%p4723_p5), 1, %s4528_s16  }
  0x50   : > { %s3632_s30 = sshll.u32 (!%p4723_p5), %s232_s13, 4  ;;  %s233_s15 = scalar_lea.sflag (!%p4723_p5), [#allocation3], %s232_s13 }
  0x51   : > { %s236_s23 = scalar_lea.vmem (!%p4723_p5), [#allocation2], %s3632_s30  ;;  %p5215_p7 = scmp.ne.s32.totalorder (!%p4723_p5), %s5210_s29, 0 }
  0x56   : > { %4515 = dma.done.wait (%p5215_p7), %s233_s15, 256  }
  0x57   : > { %4517 = vsyncadd (%p5215_p7), %s233_s15, 4294967040  ;;  %s242_s26 = scalar_lea.sflag [#allocation5], %s232_s13  ;;  %s245_s6 = scalar_lea.vmem [#allocation4], %s3632_s30 }
  0x58   : > { %4519 = dma.done.wait (%p5215_p7), %s242_s26, 256  }
  0x59   : > { %4521 = vsyncadd (%p5215_p7), %s242_s26, 4294967040  ;;  %vm297_vm0 = vcmask 130048   ;;  %v288_v0 = vld [vmem:[%s5204_s2] sm:$0xff]  ;;  %v289_v1 = vld [vmem:[%s5204_s2 + $0x8] sm:$0xff]  ;;  %vm4559_vm1 = vmmov 0   ;;  %vm3490_vm2 = vcmask 46080  }
  0x5a   : > { %v284_v2 = vld [vmem:[%s236_s23] sm:$0xff]  ;;  %v329_v3 = vand.u32 4294901760, %v288_v0  ;;  %v332_v4 = vand.u32 4294901760, %v289_v1  ;;  %v285_v8 = vld [vmem:[%s236_s23 + $0x8] sm:$0xff]  ;;  %p277_p10 = scmp.lt.s32.totalorder %s4540_s19, 1  ;;  %p279_p13 = scmp.lt.s32.totalorder %s4536_s18, 3 }
  0x5b   : > { %v286_v5 = vld [vmem:[%s245_s6] sm:$0xff]  ;;  %v291_v6 = vmul.f32 %v284_v2, %v284_v2  ;;  %v299_v7 = vsel %vm297_vm0, %v284_v2, 0  ;;  %v287_v9 = vld [vmem:[%s245_s6 + $0x8] sm:$0xff]  ;;  %v302_v12 = vsel %vm297_vm0, %v285_v8, 0  ;;  %v292_v25 = vmul.f32 %v285_v8, %v285_v8 }
  0x5c   : > { %v295_v10 = vmul.f32 %v286_v5, %v284_v2  ;;  %v4778_v11 = vand.u32 4294901760, %v299_v7  ;;  %v305_v13 = vsel %vm297_vm0, %v286_v5, 0  ;;  %v4782_v14 = vpack.c.bf16 %v332_v4, %v329_v3  ;;  %s5230_s19 = smov (!%p277_p10, %s4540_s19), 1  ;;  %s5232_s18 = smov (!%p279_p13, %s4536_s18), 3 }
  0x5d   : > { %v4784_v15 = vand.u32 4294901760, %v302_v12  ;;  %v4786_v16 = vand.u32 4294901760, %v305_v13  ;;  %v308_v17 = vsel %vm297_vm0, %v287_v9, 0  ;;  %v4794_v20 = vsub.f32 %v288_v0, %v329_v3  ;;  %s3634_s11 = sshll.u32 %s5230_s19, 2 }
  0x5e   : > { %v4790_v18 = vsub.f32 %v299_v7, %v4778_v11  ;;  %v4792_v19 = vand.u32 4294901760, %v308_v17  ;;  %v4796_v21 = vsub.f32 %v289_v1, %v332_v4  ;;  %4124 = vmatprep.subr.bf16.mxu0 %v4782_v14  ;;  %v311_v24 = vsel %vm297_vm0, %v291_v6, 0  ;;  %s282_s7 = sadd.s32 %s3634_s11, %s5232_s18 }
  0x5f   : > { %v4800_v22 = vsub.f32 %v302_v12, %v4784_v15  ;;  %v4803_v23 = vsub.f32 %v305_v13, %v4786_v16  ;;  %4126 = vmatpush3.bf16.msra.mxu0 %v4782_v14  ;;  %v498_v28 = vand.u32 4294901760, %v4794_v20  ;;  %v4815_v32 = vand.u32 4294901760, %v311_v24  ;;  %s283_s27 = scalar_lea.vmem %s5206_s4, %s282_s7 }
  0x60   : > { %v397_v26 = vand.u32 4294901760, %v4790_v18  ;;  %v4809_v27 = vsub.f32 %v308_v17, %v4792_v19  ;;  %v505_v29 = vand.u32 4294901760, %v4796_v21  ;;  %v314_v33 = vsel %vm297_vm0, %v292_v25, 0 }
  0x61   : > { %v407_v30 = vand.u32 4294901760, %v4800_v22  ;;  %v417_v31 = vand.u32 4294901760, %v4803_v23  ;;  %v499_v36 = vsub.f32 %v4794_v20, %v498_v28  ;;  %v4835_v40 = vsub.f32 %v311_v24, %v4815_v32 }
  0x62   : > { %v398_v34 = vsub.f32 %v4790_v18, %v397_v26  ;;  %v427_v35 = vand.u32 4294901760, %v4809_v27  ;;  %v506_v37 = vsub.f32 %v4796_v21, %v505_v29  ;;  %v4837_v41 = vand.u32 4294901760, %v314_v33 }
  0x63   : > { %v408_v38 = vsub.f32 %v4800_v22, %v407_v30  ;;  %v418_v39 = vsub.f32 %v4803_v23, %v417_v31  ;;  %v500_v44 = vand.u32 4294901760, %v499_v36  ;;  %v437_v48 = vand.u32 4294901760, %v4835_v40 }
  0x64   : > { %v399_v42 = vand.u32 4294901760, %v398_v34  ;;  %v428_v43 = vsub.f32 %v4809_v27, %v427_v35  ;;  %v507_v45 = vand.u32 4294901760, %v506_v37  ;;  %v4844_v49 = vsub.f32 %v314_v33, %v4837_v41 }
  0x65   : > { %v409_v46 = vand.u32 4294901760, %v408_v38  ;;  %v419_v47 = vand.u32 4294901760, %v418_v39  ;;  %v293_v52 = vmul.f32 %v286_v5, %v286_v5  ;;  %v294_v53 = vmul.f32 %v287_v9, %v287_v9 }
  0x66   : > { %3803 = vmatprep.mubr.f32.mxu0 %v399_v42  ;;  %v429_v50 = vand.u32 4294901760, %v428_v43  ;;  %v4127_v51 = vpack.c.bf16 %v507_v45, %v500_v44  ;;  %v438_v54 = vsub.f32 %v4835_v40, %v437_v48  ;;  %v447_v55 = vand.u32 4294901760, %v4844_v49 }
  0x67   : > { %3804 = vmatmul.mubr.f32.vlgmr.msra.gmra.mrb[0].mxu0 %v409_v46  ;;  %v323_v56 = vsel %vm297_vm0, %v295_v10, 0  ;;  %v296_v57 = vmul.f32 %v287_v9, %v285_v8  ;;  %v317_v58 = vsel %vm297_vm0, %v293_v52, 0  ;;  %v320_v59 = vsel %vm297_vm0, %v294_v53, 0 }
  0x68   : > { %3806 = vmatprep.mubr.f32.mxu0 %v419_v47  ;;  %4128 = vmatprep.subr.bf16.mxu0 %v4127_v51  ;;  %v4853_v60 = vand.u32 4294901760, %v323_v56  ;;  %v4131_v61 = vpack.c.bf16 %v4796_v21, %v4794_v20  ;;  %v439_v62 = vand.u32 4294901760, %v438_v54  ;;  %v448_v63 = vsub.f32 %v4844_v49, %v447_v55 }
  0x69   : > { %4130 = vmatpush3.bf16.msra.mxu0 %v4127_v51  ;;  %v4860_v0 = vand.u32 4294901760, %v317_v58  ;;  %v4862_v1 = vand.u32 4294901760, %v320_v59  ;;  %v326_v3 = vsel %vm297_vm0, %v296_v57, 0  ;;  %v4139_v39 = vpack.c.bf16 %v505_v29, %v498_v28 }
  0x6a   : > { %v476_v2 = vsub.f32 %v323_v56, %v4853_v60  ;;  %4132 = vmatprep.subr.bf16.mxu0 %v4131_v61  ;;  %v449_v4 = vand.u32 4294901760, %v448_v63  ;;  %v4868_v7 = vand.u32 4294901760, %v326_v3  ;;  %vm3502_vm3 = vcmask 0  }
  0x6b   : > { %3807 = vmatmul.mubr.f32.gmra.mrb[2].mxu0 %v429_v50  ;;  %v456_v5 = vsub.f32 %v317_v58, %v4860_v0  ;;  %v466_v6 = vsub.f32 %v320_v59, %v4862_v1 }
  0x6c   : > { %3809 = vmatprep.mubr.f32.mxu0 %v439_v62  ;;  %v477_v8 = vand.u32 4294901760, %v476_v2  ;;  %v486_v12 = vsub.f32 %v326_v3, %v4868_v7 }
  0x6d   : > { %v457_v9 = vand.u32 4294901760, %v456_v5  ;;  %v467_v10 = vand.u32 4294901760, %v466_v6 }
  0x6e   : > { %v478_v13 = vsub.f32 %v476_v2, %v477_v8  ;;  %v487_v25 = vand.u32 4294901760, %v486_v12 }
  0x6f   : > { %3810 = vmatmul.mubr.f32.gmra.mrb[4].mxu0 %v449_v4  ;;  %v458_v17 = vsub.f32 %v456_v5, %v457_v9  ;;  %v468_v24 = vsub.f32 %v466_v6, %v467_v10 }
  0x70   : > { %v479_v36 = vand.u32 4294901760, %v478_v13  ;;  %v488_v37 = vsub.f32 %v486_v12, %v487_v25 }
  0x71   : > { %v459_v33 = vand.u32 4294901760, %v458_v17  ;;  %v469_v34 = vand.u32 4294901760, %v468_v24 }
  0x72   : > { %v489_v38 = vand.u32 4294901760, %v488_v37 }
  0x73   : > { %3812 = vmatprep.mubr.f32.mxu0 %v459_v33 }
  0x74   : > { %3813 = vmatmul.mubr.f32.gmra.mrb[6].mxu0 %v469_v34 }
  0x75   : > { %3815 = vmatprep.mubr.f32.mxu0 %v479_v36 }
  0x78   : > { %3816 = vmatmul.mubr.f32.gmra.mrb[8].mxu0 %v489_v38 }
  0x79   : > { %3822 = vmatprep.mubr.f32.mxu0 %v4778_v11 }
  0x7c   : > { %3823 = vmatmul.mubr.f32.vlgmr.msra.gmra.mrb[0].mxu0 %v4784_v15 }
  0x7d   : > { %3825 = vmatprep.mubr.f32.mxu0 %v4786_v16  ;;  %4134 = vmatpush3.bf16.msra.mxu0 %v4131_v61 }
  0x7e   : > { %4136 = vmatprep.subr.bf16.mxu0 %v4782_v14 }
  0x80   : > { %3826 = vmatmul.mubr.f32.gmra.mrb[2].mxu0 %v4792_v19 }
  0x81   : > { %3828 = vmatprep.mubr.f32.mxu0 %v4815_v32 }
  0x84   : > { %3829 = vmatmul.mubr.f32.gmra.mrb[4].mxu0 %v4837_v41 }
  0x85   : > { %3831 = vmatprep.mubr.f32.mxu0 %v4860_v0 }
  0x88   : > { %3832 = vmatmul.mubr.f32.gmra.mrb[6].mxu0 %v4862_v1 }
  0x89   : > { %3834 = vmatprep.mubr.f32.mxu0 %v4853_v60 }
  0x8c   : > { %3835 = vmatmul.mubr.f32.gmra.mrb[8].mxu0 %v4868_v7 }
  0x8d   : > { %3841 = vmatprep.mubr.f32.mxu0 %v4790_v18 }
  0x90   : > { %3842 = vmatmul.mubr.f32.vlgmr.msra.gmra.mrb[0].mxu0 %v4800_v22 }
  0x91   : > { %3844 = vmatprep.mubr.f32.mxu0 %v4803_v23  ;;  %4138 = vmatpush3.bf16.msra.mxu0 %v4782_v14 }
  0x92   : > { %4140 = vmatprep.subr.bf16.mxu0 %v4139_v39 }
  0x94   : > { %3845 = vmatmul.mubr.f32.gmra.mrb[2].mxu0 %v4809_v27 }
  0x95   : > { %3847 = vmatprep.mubr.f32.mxu0 %v4835_v40 }
  0x98   : > { %3848 = vmatmul.mubr.f32.gmra.mrb[4].mxu0 %v4844_v49 }
  0x99   : > { %3850 = vmatprep.mubr.f32.mxu0 %v456_v5 }
  0x9c   : > { %3851 = vmatmul.mubr.f32.gmra.mrb[6].mxu0 %v466_v6 }
  0x9d   : > { %3853 = vmatprep.mubr.f32.mxu0 %v476_v2 }
  0xa0   : > { %3854 = vmatmul.mubr.f32.gmra.mrb[8].mxu0 %v486_v12 }
  0xa1   : > { %3860 = vmatprep.mubr.f32.mxu0 %v397_v26 }
  0xa4   : > { %3861 = vmatmul.mubr.f32.vlgmr.msra.gmra.mrb[0].mxu0 %v407_v30 }
  0xa5   : > { %3863 = vmatprep.mubr.f32.mxu0 %v417_v31  ;;  %4142 = vmatpush3.bf16.msra.mxu0 %v4139_v39 }
  0xa6   : > { %4144 = vmatprep.subr.bf16.mxu0 %v4782_v14 }
  0xa8   : > { %3864 = vmatmul.mubr.f32.gmra.mrb[2].mxu0 %v427_v35 }
  0xa9   : > { %3866 = vmatprep.mubr.f32.mxu0 %v437_v48 }
  0xac   : > { %3867 = vmatmul.mubr.f32.gmra.mrb[4].mxu0 %v447_v55 }
  0xad   : > { %3869 = vmatprep.mubr.f32.mxu0 %v457_v9 }
  0xb0   : > { %3870 = vmatmul.mubr.f32.gmra.mrb[6].mxu0 %v467_v10 }
  0xb1   : > { %3872 = vmatprep.mubr.f32.mxu0 %v477_v8 }
  0xb4   : > { %3873 = vmatmul.mubr.f32.gmra.mrb[8].mxu0 %v487_v25 }
  0xb5   : > { %3879 = vmatprep.mubr.f32.mxu0 %v4778_v11 }
  0xb8   : > { %3880 = vmatmul.mubr.f32.vlgmr.msra.gmra.mrb[0].mxu0 %v4784_v15 }
  0xb9   : > { %3882 = vmatprep.mubr.f32.mxu0 %v4786_v16  ;;  %4146 = vmatpush3.bf16.msra.mxu0 %v4782_v14  ;;  %v4558_v14 = vmov 0.0|0.0  }
  0xba   : > { %4147 = vmatprep.subr.bf16.mxu1 %v4558_v14 }
  0xbc   : > { %3883 = vmatmul.mubr.f32.gmra.mrb[2].mxu0 %v4792_v19 }
  0xbd   : > { %3885 = vmatprep.mubr.f32.mxu0 %v4815_v32 }
  0xc0   : > { %3886 = vmatmul.mubr.f32.gmra.mrb[4].mxu0 %v4837_v41 }
  0xc1   : > { %3888 = vmatprep.mubr.f32.mxu0 %v4860_v0 }
  0xc4   : > { %3889 = vmatmul.mubr.f32.gmra.mrb[6].mxu0 %v4862_v1 }
  0xc5   : > { %3891 = vmatprep.mubr.f32.mxu0 %v4853_v60 }
  0xc8   : > { %3892 = vmatmul.mubr.f32.gmra.mrb[8].mxu0 %v4868_v7 }
  0xc9   : > { %3898 = vmatprep.mubr.f32.mxu0 %v4778_v11  ;;  %v4560_v11 = vmov 0.0  }
  0xca   : > { %3917 = vmatprep.mubr.msk.f32.mxu1 %vm4559_vm1, %v4560_v11 }
  0xcc   : > { %3899 = vmatmul.mubr.f32.vlgmr.msra.gmra.mrb[0].mxu0 %v4784_v15  ;;  %v290_v15 = vld [vmem:[%s5205_s3] sm:$0x3f] }
  0xcd   : > { %3901 = vmatprep.mubr.f32.mxu0 %v4786_v16  ;;  %v1175_v16 = vsel %vm297_vm0, %v290_v15, 0 }
  0xce   : > { %v4934_v18 = vand.u32 4294901760, %v1175_v16 }
  0xd0   : > { %3902 = vmatmul.mubr.f32.gmra.mrb[2].mxu0 %v4792_v19  ;;  %v4937_v19 = vsub.f32 %v1175_v16, %v4934_v18 }
  0xd1   : > { %3904 = vmatprep.mubr.f32.mxu0 %v4815_v32 }
  0xd2   : > { %v4940_v20 = vand.u32 4294901760, %v4937_v19 }
  0xd4   : > { %3905 = vmatmul.mubr.f32.gmra.mrb[4].mxu0 %v4837_v41  ;;  %v1247_v26 = vsub.f32 %v4937_v19, %v4940_v20 }
  0xd5   : > { %3907 = vmatprep.mubr.f32.mxu0 %v4860_v0 }
  0xd6   : > { %v4951_v41 = vand.u32 4294901760, %v1247_v26 }
  0xd8   : > { %3908 = vmatmul.mubr.f32.gmra.mrb[6].mxu0 %v4862_v1 }
  0xd9   : > { %3910 = vmatprep.mubr.f32.mxu0 %v4853_v60 }
  0xdc   : > { %3911 = vmatmul.mubr.f32.gmra.mrb[8].mxu0 %v4868_v7 }
 0x19f   : > { %v3900_v21 = vpop.f32.mrb[0].mxu0 }
 0x1a0   : > { %v1181_v22 = vand.u32 4294901760, %v3900_v21  ;;  %v1116_v23 = vpop.f32.mrb[1].mxu0 }
 0x1a1   : > { %v1178_v27 = vand.u32 4294901760, %v1116_v23 }
 0x1a2   : > { %v4944_v28 = vsub.f32 %v3900_v21, %v1181_v22 }
 0x1a3   : > { %v4946_v29 = vpack.c.bf16 %v1181_v22, %v1178_v27  ;;  %v4948_v30 = vsub.f32 %v1116_v23, %v1178_v27  ;;  %v3903_v31 = vpop.f32.mrb[2].mxu0 }
 0x1a4   : > { %v1264_v32 = vand.u32 4294901760, %v4944_v28  ;;  %v1640_v35 = vand.u32 4294901760, %v3903_v31  ;;  %v1128_v40 = vpop.f32.mrb[3].mxu0 }
 0x1a5   : > { %v1257_v42 = vand.u32 4294901760, %v4948_v30  ;;  %v4154_v43 = vpack.c.bf16 %v4944_v28, %v4948_v30  ;;  %v1637_v44 = vand.u32 4294901760, %v1128_v40  ;;  %4149 = vmatpush3.bf16.msra.mxu1 %v4946_v29 }
 0x1a6   : > { %v1265_v45 = vsub.f32 %v4944_v28, %v1264_v32  ;;  %v4958_v46 = vsub.f32 %v3903_v31, %v1640_v35  ;;  %4150 = vmatprep.subr.bf16.mxu1 %v4558_v14 }
 0x1a7   : > { %v1258_v47 = vsub.f32 %v4948_v30, %v1257_v42  ;;  %v4962_v48 = vpack.c.bf16 %v1640_v35, %v1637_v44  ;;  %v4964_v49 = vsub.f32 %v1128_v40, %v1637_v44  ;;  %v3906_v50 = vpop.f32.mrb[4].mxu0  ;;  %v4966_v51 = vpack.c.bf16 %v1264_v32, %v1257_v42 }
 0x1a8   : > { %v1266_v52 = vand.u32 4294901760, %v1265_v45  ;;  %v1723_v53 = vand.u32 4294901760, %v4958_v46  ;;  %v2099_v54 = vand.u32 4294901760, %v3906_v50  ;;  %v1140_v55 = vpop.f32.mrb[5].mxu0  ;;  %3918 = vmatmul.mubr.f32.vlgmr.msra.gmra.mrb[0].mxu1 %v4951_v41 }
 0x1a9   : > { %v1259_v56 = vand.u32 4294901760, %v1258_v47  ;;  %v1716_v57 = vand.u32 4294901760, %v4964_v49  ;;  %v4172_v58 = vpack.c.bf16 %v4958_v46, %v4964_v49  ;;  %v2096_v59 = vand.u32 4294901760, %v1140_v55  ;;  %3924 = vmatprep.mubr.msk.f32.mxu1 %vm4559_vm1, %v4560_v11 }
 0x1aa   : > { %v1724_v60 = vsub.f32 %v4958_v46, %v1723_v53  ;;  %v4976_v61 = vsub.f32 %v3906_v50, %v2099_v54 }
 0x1ab   : > { %v1717_v62 = vsub.f32 %v4964_v49, %v1716_v57  ;;  %v4979_v63 = vpack.c.bf16 %v2099_v54, %v2096_v59  ;;  %v4981_v0 = vsub.f32 %v1140_v55, %v2096_v59  ;;  %v3909_v1 = vpop.f32.mrb[6].mxu0  ;;  %v4151_v2 = vpack.c.bf16 %v1266_v52, %v1259_v56 }
 0x1ac   : > { %v1725_v3 = vand.u32 4294901760, %v1724_v60  ;;  %v2182_v4 = vand.u32 4294901760, %v4976_v61  ;;  %v2558_v5 = vand.u32 4294901760, %v3909_v1  ;;  %v1152_v6 = vpop.f32.mrb[7].mxu0  ;;  %v4984_v7 = vpack.c.bf16 %v1723_v53, %v1716_v57 }
 0x1ad   : > { %v1718_v8 = vand.u32 4294901760, %v1717_v62  ;;  %v2175_v9 = vand.u32 4294901760, %v4981_v0  ;;  %v4190_v10 = vpack.c.bf16 %v4976_v61, %v4981_v0  ;;  %v2555_v12 = vand.u32 4294901760, %v1152_v6  ;;  %4152 = vmatpush3.bf16.msra.mxu1 %v4151_v2 }
 0x1ae   : > { %v2183_v13 = vsub.f32 %v4976_v61, %v2182_v4  ;;  %v4990_v17 = vsub.f32 %v3909_v1, %v2558_v5  ;;  %4153 = vmatprep.subr.bf16.mxu1 %v4558_v14 }
 0x1af   : > { %v2176_v24 = vsub.f32 %v4981_v0, %v2175_v9  ;;  %v4994_v25 = vpack.c.bf16 %v2558_v5, %v2555_v12  ;;  %v4996_v33 = vsub.f32 %v1152_v6, %v2555_v12  ;;  %v3912_v34 = vpop.f32.mrb[8].mxu0  ;;  %v4169_v36 = vpack.c.bf16 %v1725_v3, %v1718_v8 }
 0x1b0   : > { %v2184_v37 = vand.u32 4294901760, %v2183_v13  ;;  %v2641_v38 = vand.u32 4294901760, %v4990_v17  ;;  %v3017_v39 = vand.u32 4294901760, %v3912_v34  ;;  %v1164_v15 = vpop.f32.mrb[9].mxu0  ;;  %3925 = vmatmul.mubr.f32.vlgmr.msra.gmra.mrb[0].mxu1 %v4934_v18  ;;  %v5000_v16 = vpack.c.bf16 %v2182_v4, %v2175_v9 }
 0x1b1   : > { %v2177_v21 = vand.u32 4294901760, %v2176_v24  ;;  %v2634_v22 = vand.u32 4294901760, %v4996_v33  ;;  %v4208_v23 = vpack.c.bf16 %v4990_v17, %v4996_v33  ;;  %v3014_v26 = vand.u32 4294901760, %v1164_v15  ;;  %4155 = vmatpush3.bf16.msra.mxu1 %v4154_v43  ;;  %3931 = vmatprep.mubr.msk.f32.mxu1 %vm4559_vm1, %v4560_v11 }
 0x1b2   : > { %v2642_v27 = vsub.f32 %v4990_v17, %v2641_v38  ;;  %v5008_v28 = vsub.f32 %v3912_v34, %v3017_v39  ;;  %4156 = vmatprep.subr.bf16.mxu1 %v4558_v14 }
 0x1b3   : > { %v2635_v30 = vsub.f32 %v4996_v33, %v2634_v22  ;;  %v5012_v31 = vpack.c.bf16 %v3017_v39, %v3014_v26  ;;  %v5014_v32 = vsub.f32 %v1164_v15, %v3014_v26  ;;  %v4187_v35 = vpack.c.bf16 %v2184_v37, %v2177_v21 }
 0x1b4   : > { %v2643_v40 = vand.u32 4294901760, %v2642_v27  ;;  %v3100_v42 = vand.u32 4294901760, %v5008_v28  ;;  %v5017_v43 = vpack.c.bf16 %v2641_v38, %v2634_v22 }
 0x1b5   : > { %v2636_v44 = vand.u32 4294901760, %v2635_v30  ;;  %v3093_v45 = vand.u32 4294901760, %v5014_v32  ;;  %v4226_v47 = vpack.c.bf16 %v5008_v28, %v5014_v32 }
 0x1b6   : > { %v3101_v50 = vsub.f32 %v5008_v28, %v3100_v42 }
 0x1b7   : > { %v3094_v52 = vsub.f32 %v5014_v32, %v3093_v45  ;;  %v5024_v53 = vpack.c.bf16 %v3100_v42, %v3093_v45  ;;  %v5026_v54 = vpack.c.bf16 %v2643_v40, %v2636_v44 }
 0x1b8   : > { %v3102_v55 = vand.u32 4294901760, %v3101_v50  ;;  %3932 = vmatmul.mubr.f32.vlgmr.msra.gmra.mrb[0].mxu1 %v4937_v19 }
 0x1b9   : > { %v3095_v56 = vand.u32 4294901760, %v3094_v52  ;;  %4158 = vmatpush3.bf16.msra.mxu1 %v4946_v29  ;;  %3938 = vmatprep.mubr.msk.f32.mxu1 %vm4559_vm1, %v4560_v11 }
 0x1ba   : > { %4159 = vmatprep.subr.bf16.mxu1 %v4558_v14 }
 0x1bb   : > { %v5033_v57 = vpack.c.bf16 %v3102_v55, %v3095_v56 }
 0x1c0   : > { %3939 = vmatmul.mubr.f32.vlgmr.msra.gmra.mrb[0].mxu1 %v4940_v20 }
 0x1c1   : > { %4161 = vmatpush3.bf16.msra.mxu1 %v4966_v51  ;;  %3945 = vmatprep.mubr.msk.f32.mxu1 %vm4559_vm1, %v4560_v11 }
 0x1c2   : > { %4162 = vmatprep.subr.bf16.mxu1 %v4558_v14 }
 0x1c8   : > { %3946 = vmatmul.mubr.f32.vlgmr.msra.gmra.mrb[0].mxu1 %v4934_v18 }
 0x1c9   : > { %4164 = vmatpush3.bf16.msra.mxu1 %v4946_v29  ;;  %3952 = vmatprep.mubr.msk.f32.mxu1 %vm4559_vm1, %v4560_v11 }
 0x1ca   : > { %4165 = vmatprep.subr.bf16.mxu1 %v4558_v14 }
 0x1d0   : > { %3953 = vmatmul.mubr.f32.vlgmr.msra.gmra.mrb[0].mxu1 %v4934_v18 }
 0x1d1   : > { %4167 = vmatpush3.bf16.msra.mxu1 %v4962_v48  ;;  %3959 = vmatprep.mubr.msk.f32.mxu1 %vm4559_vm1, %v4560_v11 }
 0x1d2   : > { %4168 = vmatprep.subr.bf16.mxu1 %v4558_v14 }
 0x1d4   : > { %3960 = vmatmul.mubr.f32.vlgmr.msra.gmra.mrb[2].mxu1 %v4951_v41 }
 0x1d5   : > { %4170 = vmatpush3.bf16.msra.mxu1 %v4169_v36  ;;  %3966 = vmatprep.mubr.msk.f32.mxu1 %vm4559_vm1, %v4560_v11 }
 0x1d6   : > { %4171 = vmatprep.subr.bf16.mxu1 %v4558_v14 }
 0x1dc   : > { %3967 = vmatmul.mubr.f32.vlgmr.msra.gmra.mrb[2].mxu1 %v4934_v18 }
 0x1dd   : > { %4173 = vmatpush3.bf16.msra.mxu1 %v4172_v58  ;;  %3973 = vmatprep.mubr.msk.f32.mxu1 %vm4559_vm1, %v4560_v11 }
 0x1de   : > { %4174 = vmatprep.subr.bf16.mxu1 %v4558_v14 }
 0x1e4   : > { %3974 = vmatmul.mubr.f32.vlgmr.msra.gmra.mrb[2].mxu1 %v4937_v19 }
 0x1e5   : > { %4176 = vmatpush3.bf16.msra.mxu1 %v4962_v48  ;;  %3980 = vmatprep.mubr.msk.f32.mxu1 %vm4559_vm1, %v4560_v11 }
 0x1e6   : > { %4177 = vmatprep.subr.bf16.mxu1 %v4558_v14 }
 0x1ec   : > { %3981 = vmatmul.mubr.f32.vlgmr.msra.gmra.mrb[2].mxu1 %v4940_v20 }
 0x1ed   : > { %4179 = vmatpush3.bf16.msra.mxu1 %v4984_v7  ;;  %3987 = vmatprep.mubr.msk.f32.mxu1 %vm4559_vm1, %v4560_v11 }
 0x1ee   : > { %4180 = vmatprep.subr.bf16.mxu1 %v4558_v14 }
 0x1f4   : > { %3988 = vmatmul.mubr.f32.vlgmr.msra.gmra.mrb[2].mxu1 %v4934_v18 }
 0x1f5   : > { %4182 = vmatpush3.bf16.msra.mxu1 %v4962_v48  ;;  %3994 = vmatprep.mubr.msk.f32.mxu1 %vm4559_vm1, %v4560_v11 }
 0x1f6   : > { %4183 = vmatprep.subr.bf16.mxu1 %v4558_v14 }
 0x1fc   : > { %3995 = vmatmul.mubr.f32.vlgmr.msra.gmra.mrb[2].mxu1 %v4934_v18 }
 0x1fd   : > { %4185 = vmatpush3.bf16.msra.mxu1 %v4979_v63  ;;  %4001 = vmatprep.mubr.msk.f32.mxu1 %vm4559_vm1, %v4560_v11 }
 0x1fe   : > { %4186 = vmatprep.subr.bf16.mxu1 %v4558_v14 }
 0x200   : > { %4002 = vmatmul.mubr.f32.vlgmr.msra.gmra.mrb[4].mxu1 %v4951_v41 }
 0x201   : > { %4188 = vmatpush3.bf16.msra.mxu1 %v4187_v35  ;;  %4008 = vmatprep.mubr.msk.f32.mxu1 %vm4559_vm1, %v4560_v11 }
 0x202   : > { %4189 = vmatprep.subr.bf16.mxu1 %v4558_v14 }
 0x208   : > { %4009 = vmatmul.mubr.f32.vlgmr.msra.gmra.mrb[4].mxu1 %v4934_v18 }
 0x209   : > { %4191 = vmatpush3.bf16.msra.mxu1 %v4190_v10  ;;  %4015 = vmatprep.mubr.msk.f32.mxu1 %vm4559_vm1, %v4560_v11 }
 0x20a   : > { %4192 = vmatprep.subr.bf16.mxu1 %v4558_v14 }
 0x210   : > { %4016 = vmatmul.mubr.f32.vlgmr.msra.gmra.mrb[4].mxu1 %v4937_v19 }
 0x211   : > { %4194 = vmatpush3.bf16.msra.mxu1 %v4979_v63  ;;  %4022 = vmatprep.mubr.msk.f32.mxu1 %vm4559_vm1, %v4560_v11 }
 0x212   : > { %4195 = vmatprep.subr.bf16.mxu1 %v4558_v14 }
 0x218   : > { %4023 = vmatmul.mubr.f32.vlgmr.msra.gmra.mrb[4].mxu1 %v4940_v20 }
 0x219   : > { %4197 = vmatpush3.bf16.msra.mxu1 %v5000_v16  ;;  %4029 = vmatprep.mubr.msk.f32.mxu1 %vm4559_vm1, %v4560_v11 }
 0x21a   : > { %4198 = vmatprep.subr.bf16.mxu1 %v4558_v14 }
 0x220   : > { %4030 = vmatmul.mubr.f32.vlgmr.msra.gmra.mrb[4].mxu1 %v4934_v18 }
 0x221   : > { %4200 = vmatpush3.bf16.msra.mxu1 %v4979_v63  ;;  %4036 = vmatprep.mubr.msk.f32.mxu1 %vm4559_vm1, %v4560_v11 }
 0x222   : > { %4201 = vmatprep.subr.bf16.mxu1 %v4558_v14 }
 0x228   : > { %4037 = vmatmul.mubr.f32.vlgmr.msra.gmra.mrb[4].mxu1 %v4934_v18 }
 0x229   : > { %4203 = vmatpush3.bf16.msra.mxu1 %v4994_v25  ;;  %4043 = vmatprep.mubr.msk.f32.mxu1 %vm4559_vm1, %v4560_v11 }
 0x22a   : > { %4204 = vmatprep.subr.bf16.mxu1 %v4558_v14 }
 0x22c   : > { %4044 = vmatmul.mubr.f32.vlgmr.msra.gmra.mrb[6].mxu1 %v4951_v41 }
 0x22d   : > { %4206 = vmatpush3.bf16.msra.mxu1 %v5026_v54  ;;  %4050 = vmatprep.mubr.msk.f32.mxu1 %vm4559_vm1, %v4560_v11 }
 0x22e   : > { %4207 = vmatprep.subr.bf16.mxu1 %v4558_v14 }
 0x234   : > { %4051 = vmatmul.mubr.f32.vlgmr.msra.gmra.mrb[6].mxu1 %v4934_v18 }
 0x235   : > { %4209 = vmatpush3.bf16.msra.mxu1 %v4208_v23  ;;  %4057 = vmatprep.mubr.msk.f32.mxu1 %vm4559_vm1, %v4560_v11 }
 0x236   : > { %4210 = vmatprep.subr.bf16.mxu1 %v4558_v14 }
 0x23c   : > { %4058 = vmatmul.mubr.f32.vlgmr.msra.gmra.mrb[6].mxu1 %v4937_v19 }
 0x23d   : > { %4212 = vmatpush3.bf16.msra.mxu1 %v4994_v25  ;;  %4064 = vmatprep.mubr.msk.f32.mxu1 %vm4559_vm1, %v4560_v11 }
 0x23e   : > { %4213 = vmatprep.subr.bf16.mxu1 %v4558_v14 }
 0x244   : > { %4065 = vmatmul.mubr.f32.vlgmr.msra.gmra.mrb[6].mxu1 %v4940_v20 }
 0x245   : > { %4215 = vmatpush3.bf16.msra.mxu1 %v5017_v43  ;;  %4071 = vmatprep.mubr.msk.f32.mxu1 %vm4559_vm1, %v4560_v11 }
 0x246   : > { %4216 = vmatprep.subr.bf16.mxu1 %v4558_v14 }
 0x24c   : > { %4072 = vmatmul.mubr.f32.vlgmr.msra.gmra.mrb[6].mxu1 %v4934_v18 }
 0x24d   : > { %4218 = vmatpush3.bf16.msra.mxu1 %v4994_v25  ;;  %4078 = vmatprep.mubr.msk.f32.mxu1 %vm4559_vm1, %v4560_v11 }
 0x24e   : > { %4219 = vmatprep.subr.bf16.mxu1 %v4558_v14 }
 0x254   : > { %4079 = vmatmul.mubr.f32.vlgmr.msra.gmra.mrb[6].mxu1 %v4934_v18 }
 0x255   : > { %4221 = vmatpush3.bf16.msra.mxu1 %v5012_v31  ;;  %4085 = vmatprep.mubr.msk.f32.mxu1 %vm4559_vm1, %v4560_v11 }
 0x256   : > { %4222 = vmatprep.subr.bf16.mxu1 %v4558_v14 }
 0x258   : > { %4086 = vmatmul.mubr.f32.vlgmr.msra.gmra.mrb[8].mxu1 %v4951_v41 }
 0x259   : > { %4224 = vmatpush3.bf16.msra.mxu1 %v5033_v57  ;;  %4092 = vmatprep.mubr.msk.f32.mxu1 %vm4559_vm1, %v4560_v11 }
 0x25a   : > { %4225 = vmatprep.subr.bf16.mxu1 %v4558_v14 }
 0x260   : > { %4093 = vmatmul.mubr.f32.vlgmr.msra.gmra.mrb[8].mxu1 %v4934_v18 }
 0x261   : > { %4227 = vmatpush3.bf16.msra.mxu1 %v4226_v47  ;;  %4099 = vmatprep.mubr.msk.f32.mxu1 %vm4559_vm1, %v4560_v11 }
 0x262   : > { %4228 = vmatprep.subr.bf16.mxu1 %v4558_v14 }
 0x268   : > { %4100 = vmatmul.mubr.f32.vlgmr.msra.gmra.mrb[8].mxu1 %v4937_v19 }
 0x269   : > { %4230 = vmatpush3.bf16.msra.mxu1 %v5012_v31  ;;  %4106 = vmatprep.mubr.msk.f32.mxu1 %vm4559_vm1, %v4560_v11 }
 0x26a   : > { %4231 = vmatprep.subr.bf16.mxu1 %v4558_v14 }
 0x270   : > { %4107 = vmatmul.mubr.f32.vlgmr.msra.gmra.mrb[8].mxu1 %v4940_v20 }
 0x271   : > { %4233 = vmatpush3.bf16.msra.mxu1 %v5024_v53  ;;  %4113 = vmatprep.mubr.msk.f32.mxu1 %vm4559_vm1, %v4560_v11 }
 0x272   : > { %4234 = vmatprep.subr.bf16.mxu1 %v4558_v14 }
 0x278   : > { %4114 = vmatmul.mubr.f32.vlgmr.msra.gmra.mrb[8].mxu1 %v4934_v18 }
 0x279   : > { %4236 = vmatpush3.bf16.msra.mxu1 %v5012_v31  ;;  %4120 = vmatprep.mubr.msk.f32.mxu1 %vm4559_vm1, %v4560_v11 }
 0x280   : > { %4121 = vmatmul.mubr.f32.vlgmr.msra.gmra.mrb[8].mxu1 %v4934_v18 }
 0x2a3   : > { %v1632_v19 = vpop.f32.mrb[0].mxu1 }
 0x2a4   : > { %v3954_v29 = vpop.f32.mrb[1].mxu1  ;;  %v3472_v20 = vmul.f32 %v1632_v19, %v1632_v19 }
 0x2cf   : > { %v2091_v41 = vpop.f32.mrb[2].mxu1 }
 0x2d0   : > { %v3473_v46 = vmul.f32 %v2091_v41, %v2091_v41  ;;  %v3474_v48 = vmul.f32 %v2091_v41, %v1632_v19  ;;  %v3996_v49 = vpop.f32.mrb[3].mxu1 }
 0x2d2   : > { %v3481_v51 = vadd.f32 %v3473_v46, %v3472_v20  ;;  %v3475_v2 = vmul.f32 2.0, %v3474_v48 }
 0x2d4   : > { %v3482_v0 = vadd.f32 0.0001, %v3481_v51  ;;  %v3476_v6 = vadd.f32 0.0001, %v3475_v2 }
 0x2fb   : > { %v2550_v58 = vpop.f32.mrb[4].mxu1 }
 0x2fc   : > { %v3483_v59 = vsub.f32 %v2550_v58, %v3472_v20  ;;  %v4038_v14 = vpop.f32.mrb[5].mxu1 }
 0x327   : > { %v3009_v60 = vpop.f32.mrb[6].mxu1 }
 0x328   : > { %v3484_v61 = vsub.f32 %v3009_v60, %v3473_v46  ;;  %v4080_v62 = vpop.f32.mrb[7].mxu1 }
 0x32a   : > { %v3485_v63 = vadd.f32 %v3484_v61, %v3483_v59 }
 0x32c   : > { %v3486_v1 = vadd.f32 0.0009, %v3485_v63 }
 0x32e   : > { %v3487_v11 = vmul.f32 %v3486_v1, %v3482_v0 }
 0x330   : > { %4420 = vrcp.f32 %v3487_v11 }
 0x33a   : > { %v4421_v9 = vpop.eup %4420 }
 0x353   : > { %v3468_v18 = vpop.f32.mrb[8].mxu1 }
 0x354   : > { %v3477_v3 = vsub.f32 %v3468_v18, %v3474_v48  ;;  %v4122_v4 = vpop.f32.mrb[9].mxu1 }
 0x356   : > { %v3478_v5 = vmul.f32 2.0, %v3477_v3 }
 0x358   : > { %v3479_v7 = vadd.f32 0.0009, %v3478_v5 }
 0x35a   : > { %v3480_v8 = vmul.f32 %v3479_v7, %v3476_v6 }
 0x35c   : > { %v3489_v10 = vmul.f32 %v4421_v9, %v3480_v8 }
 0x35e   : > { %v3491_v12 = vsel %vm3490_vm2, %v3489_v10, 0.0 }
 0x35f   : > { %3492 = vadd.xlane.f32.xlu0 %v3491_v12 }
 0x3ec   : > { %v3493_v13 = vpop.xlane.xlu0 %3492 }
 0x3ed   : > { %v3494_v17 = vrot.slane %v3493_v13, 4 }
 0x3ef   : > { %v3495_v24 = vadd.f32 %v3494_v17, %v3493_v13 }
 0x3f1   : > { %v3496_v25 = vrot.slane %v3495_v24, 2 }
 0x3f3   : > { %v3497_v33 = vadd.f32 %v3496_v25, %v3495_v24 }
 0x3f5   : > { %v3498_v34 = vrot.slane %v3497_v33, 1 }
 0x3f7   : > { %v3499_v36 = vadd.f32 %v3498_v34, %v3497_v33 }
 0x3f9   : > { %4337 = vpush %v3499_v36 }
 0x42a   : > { %s4338_s13 = spop %4337 }
 0x42b   : > { %v3501_v37 = vstv %s4338_s13 }
 0x42c   : > { %3503 = vst.msk [vmem:[%s283_s27] sm:$0x1] %vm3502_vm3, %v3501_v37 }
 0x42d PF: > { %s20_s22 = sadd.s32 1, %s4552_s22   ;;  %s5216_s15 = smov %s4528_s16 }
 0x42e   : > { %p17_p5 = scmp.ge.s32.totalorder %s20_s22, 10   ;;  %s5217_s16 = smov %s4532_s17 }
 0x42f   : > { %s5218_s17 = smov %s4656_s9  ;;  %s5219_s18 = smov %s4544_s20 }
 0x430   : > { %s5220_s19 = smov %s4548_s21  ;;  %s5221_s20 = smov %s5224_s24 }
 0x431   : > { %s5222_s21 = smov %s5228_s25  ;;  %19 = sbr.rel (!%p17_p5) target bundleno = 9 (0x9), region = 89 }
 0x438   :  { %3529 = vsyncpa [#allocation3], 1 }
 0x439   :  { %3531 = vsyncpa [#allocation3 + $0x1], 1 }
 0x43a   :  { %3532 = vsyncpa [#allocation5], 1 }
 0x43b   :  { %3534 = vsyncpa [#allocation5 + $0x1], 1 }

</bundles_post_ra>
